<compile_context>
chip_gen: v5e
topology: v5e:2x2
jax: 0.10.0
libtpu: 0.0.40
codegen_flags: <defaults>
</compile_context>

<pallas_src>
import math
import numpy as np
import jax
import jax.numpy as jnp
from jax.experimental import pallas as pl
from jax.experimental.pallas import tpu as pltpu


def optimized_block(x_nchw, params):
    """Runs OptimizedBlock.forward on an NCHW input via one fused Pallas kernel."""
    N, Cin, H, W = x_nchw.shape
    Cout = params["b1"].shape[0]
    assert H % 2 == 0 and W % 2 == 0, "spatial dims must be even for 2x2 avg-pool"

    # ---- flat-frame geometry -------------------------------------------------
    # padded frame: pixel (h, w) of x lives at frame index (h+1)*F + (w+1)
    F = W + 2                      # padded frame row length
    P1 = (H + 2) * F               # padded frame size
    LOUT = H * F                   # un-decimated output length (frame rows 0..H-1)
    LY2 = LOUT + F + 1             # conv2 output length needed by the pool shifts
    LH = LY2 + 2 * F + 2           # padded relu(conv1) frame length (conv2 taps)
    PE = LH + 2 * F + 2            # extended input length (conv1 taps)
    AL = F + 1                     # left zero-extension of the flat input
    AR = PE - AL - P1              # right zero-extension

    f32 = jnp.float32
    bf16 = jnp.bfloat16
    K1 = 9 * Cin

    # static strategy flags (MXU M/K-dim occupancy; see header notes)
    merge_sc = (2 * Cout) <= 128   # fold the 1x1 shortcut into the conv1 matmul
    stack_c2 = Cout <= 128         # im2col K-stacking for conv2

    # ---- fused kernel (one batch element per grid step) ----------------------
    def kernel(*refs):
        refs = list(refs)
        xe_ref, wA_ref, w2_ref = refs[0], refs[1], refs[2]
        pos = 3
        if not merge_sc:
            wsc_ref = refs[pos]; pos += 1
        b1_ref, bout_ref, mask_ref, out_ref = refs[pos:pos + 4]
        pos += 4
        col1_ref = refs[pos]; pos += 1
        if stack_c2:
            col2_ref = refs[pos]
        else:
            h1p_ref = refs[pos]

        # conv1 im2col: 9 lane-shifted copies of the padded input along K.
        for t in range(9):
            dy, dx = divmod(t, 3)
            s = dy * F + dx
            col1_ref[t * Cin:(t + 1) * Cin, :] = xe_ref[0, :, s:s + LH]

        # One MXU matmul over the stacked K = 9*Cin taps.  When the shortcut is
        # merged, rows [Cout:2*Cout) of wA hold wsc in the (1,1),(1,2),(2,1),(2,2)
        # tap groups, so the bottom half of `res` is the un-decimated
        # 2x2-pooled-x frame already multiplied by (0.25 * wsc).
        res = jnp.dot(wA_ref[...], col1_ref[...], preferred_element_type=f32)

        # relu(conv1 + b1), masked to provide conv2's zero padding, stored bf16.
        h1 = (jnp.maximum(res[:Cout] + b1_ref[...], 0.0)
              * mask_ref[...]).astype(bf16)

        if merge_sc:
            # shortcut frame: output position p sits at frame index p + F + 1.
            sc = res[Cout:, F + 1:F + 1 + LOUT]
        else:
            # fallback: 2x2 sum-pool of x via shifted adds, then 1x1 matmul.
            xs4 = (xe_ref[0, :, 2 * F + 2:2 * F + 2 + LOUT].astype(f32)
                   + xe_ref[0, :, 2 * F + 3:2 * F + 3 + LOUT].astype(f32)
                   + xe_ref[0, :, 3 * F + 2:3 * F + 2 + LOUT].astype(f32)
                   + xe_ref[0, :, 3 * F + 3:3 * F + 3 + LOUT].astype(f32))
            sc = jnp.dot(wsc_ref[...], xs4.astype(bf16),
                         preferred_element_type=f32)

        if stack_c2:
            # conv2 im2col: 9 lane-shifted copies of h1 along K, one matmul.
            for t in range(9):
                dy, dx = divmod(t, 3)
                s = dy * F + dx
                col2_ref[t * Cout:(t + 1) * Cout, :] = h1[:, s:s + LY2]
            acc2 = jnp.dot(w2_ref[...], col2_ref[...],
                           preferred_element_type=f32)
        else:
            # per-tap form (Cout already fills the MXU contraction depth).
            h1p_ref[...] = h1
            acc2 = jnp.dot(w2_ref[0], h1p_ref[:, 0:LY2],
                           preferred_element_type=f32)
            for t in range(1, 9):
                dy, dx = divmod(t, 3)
                s = dy * F + dx
                acc2 = acc2 + jnp.dot(w2_ref[t], h1p_ref[:, s:s + LY2],
                                      preferred_element_type=f32)

        # 2x2 sum-pool of conv2 via shifted adds (0.25 already folded into w2).
        pool = (acc2[:, 0:LOUT] + acc2[:, 1:LOUT + 1]
                + acc2[:, F:F + LOUT] + acc2[:, F + 1:F + 1 + LOUT])

        out_ref[0] = (pool + sc + bout_ref[...]).astype(bf16)

    # ---- wrapper glue: layout only (pad / flatten / cast), no compute --------
    xp = jnp.pad(x_nchw, ((0, 0), (0, 0), (1, 1), (1, 1)))          # (N,Cin,H+2,W+2)
    xf = xp.reshape(N, Cin, P1)
    xe = jnp.pad(xf, ((0, 0), (0, 0), (AL, AR))).astype(bf16)       # (N,Cin,PE)

    # conv1 weight with tap index folded into K (column k = tap*Cin + cin).
    w1_k = jnp.transpose(params["w1"], (0, 2, 3, 1)).reshape(Cout, K1)
    wsc2d = params["wsc"][:, :, 0, 0] * 0.25          # fold avg-pool 1/4 (exact in bf16)
    if merge_sc:
        sc_blk = jnp.zeros((Cout, 9, Cin), f32)
        for t in (4, 5, 7, 8):                        # taps (1,1),(1,2),(2,1),(2,2)
            sc_blk = sc_blk.at[:, t, :].set(wsc2d)
        wA = jnp.concatenate([w1_k, sc_blk.reshape(Cout, K1)], axis=0).astype(bf16)
        wA_spec = pl.BlockSpec((2 * Cout, K1), lambda b: (0, 0))
    else:
        wA = w1_k.astype(bf16)
        wA_spec = pl.BlockSpec((Cout, K1), lambda b: (0, 0))

    if stack_c2:
        w2 = (jnp.transpose(params["w2"], (0, 2, 3, 1))
              .reshape(Cout, 9 * Cout) * 0.25).astype(bf16)
        w2_spec = pl.BlockSpec((Cout, 9 * Cout), lambda b: (0, 0))
    else:
        w2 = (jnp.transpose(params["w2"], (2, 3, 0, 1))
              .reshape(9, Cout, Cout) * 0.25).astype(bf16)
        w2_spec = pl.BlockSpec((9, Cout, Cout), lambda b: (0, 0, 0))

    b1 = params["b1"].reshape(Cout, 1).astype(f32)
    bout = (params["b2"] + params["bsc"]).reshape(Cout, 1).astype(f32)  # fused bias

    # interior mask of the padded h1 frame (host-side: no vector int div in-kernel).
    idx = np.arange(LH)
    hq, wq = idx // F, idx % F
    mask = ((hq >= 1) & (hq <= H) & (wq >= 1) & (wq <= W)).astype(np.float32)
    mask = jnp.asarray(mask).reshape(1, LH)

    in_specs = [pl.BlockSpec((1, Cin, PE), lambda b: (b, 0, 0)), wA_spec, w2_spec]
    args = [xe, wA, w2]
    if not merge_sc:
        in_specs.append(pl.BlockSpec((Cout, Cin), lambda b: (0, 0)))
        args.append(wsc2d.astype(bf16))
    in_specs += [pl.BlockSpec((Cout, 1), lambda b: (0, 0)),
                 pl.BlockSpec((Cout, 1), lambda b: (0, 0)),
                 pl.BlockSpec((1, LH), lambda b: (0, 0))]
    args += [b1, bout, mask]

    scratch_shapes = [pltpu.VMEM((K1, LH), bf16)]               # conv1 im2col
    if stack_c2:
        scratch_shapes.append(pltpu.VMEM((9 * Cout, LY2), bf16))  # conv2 im2col
    else:
        scratch_shapes.append(pltpu.VMEM((Cout, LH), bf16))       # h1 frame

    grid_spec = pltpu.PrefetchScalarGridSpec(
        num_scalar_prefetch=0,
        grid=(N,),
        in_specs=in_specs,
        out_specs=pl.BlockSpec((1, Cout, LOUT), lambda b: (b, 0, 0)),
        scratch_shapes=scratch_shapes,
    )

    out_flat = pl.pallas_call(
        kernel,
        out_shape=jax.ShapeDtypeStruct((N, Cout, LOUT), bf16),
        grid_spec=grid_spec,
        compiler_params=pltpu.CompilerParams(
            dimension_semantics=("parallel",),
            vmem_limit_bytes=64 * 1024 * 1024),
    )(*args)

    # layout-only post-processing: the kernel wrote the pooled result at every
    # frame position p = h*F + w; pick the stride-2 (even h, even w) sub-grid.
    out = out_flat.reshape(N, Cout, H, F)[:, :, 0:H:2, 0:W:2]       # NCHW
    return out.astype(f32)


# ------------- deterministic parameter init (matches nn.Module __init__) -------------

def xavier_uniform(key, shape_oihw, gain):
    o, i, kh, kw = shape_oihw
    fan_in, fan_out = i * kh * kw, o * kh * kw
    bound = gain * math.sqrt(6.0 / (fan_in + fan_out))
    return jax.random.uniform(key, shape_oihw, jnp.float32, -bound, bound)


def conv_bias(key, out_ch, fan_in):
    bound = 1.0 / math.sqrt(fan_in)
    return jax.random.uniform(key, (out_ch,), jnp.float32, -bound, bound)


def spectral_normalize(w_oihw, key, n_iter=1, eps=1e-12):
    # torch.nn.utils.spectral_norm: power iteration on W.view(O, -1).
    o = w_oihw.shape[0]
    wm = w_oihw.reshape(o, -1)
    u = jax.random.normal(key, (o,), jnp.float32)
    u = u / (jnp.linalg.norm(u) + eps)
    v = u
    for _ in range(n_iter):
        v = wm.T @ u
        v = v / (jnp.linalg.norm(v) + eps)
        u = wm @ v
        u = u / (jnp.linalg.norm(u) + eps)
    sigma = u @ (wm @ v)
    return w_oihw / sigma


# ------------- pure-JAX reference (correctness check) -------------

def reference_forward(x, params):
    hp = jax.lax.Precision.HIGHEST

    def conv(x, w, b, pad):
        y = jax.lax.conv_general_dilated(
            x, w, window_strides=(1, 1), padding=[(pad, pad), (pad, pad)],
            dimension_numbers=("NCHW", "OIHW", "NCHW"), precision=hp)
        return y + b[None, :, None, None]

    def avg_pool2(x):
        s = jax.lax.reduce_window(x, 0.0, jax.lax.add,
                                  (1, 1, 2, 2), (1, 1, 2, 2), "VALID")
        return s * 0.25

    h = jax.nn.relu(conv(x, params["w1"], params["b1"], 1))
    res = avg_pool2(conv(h, params["w2"], params["b2"], 1))
    sc = conv(avg_pool2(x), params["wsc"], params["bsc"], 0)
    return sc + res


if __name__ == "__main__":
    N, Cin, H, W, Cout = 2, 4, 16, 16, 8
    ks = jax.random.split(jax.random.PRNGKey(0), 11)
    x = jax.random.normal(ks[0], (N, Cin, H, W), jnp.float32)

    params = {
        "w1": spectral_normalize(
            xavier_uniform(ks[1], (Cout, Cin, 3, 3), math.sqrt(2.0)), ks[2]),
        "w2": spectral_normalize(
            xavier_uniform(ks[3], (Cout, Cout, 3, 3), math.sqrt(2.0)), ks[4]),
        "wsc": spectral_normalize(
            xavier_uniform(ks[5], (Cout, Cin, 1, 1), 1.0), ks[6]),
        "b1": conv_bias(ks[7], Cout, Cin * 9),
        "b2": conv_bias(ks[8], Cout, Cout * 9),
        "bsc": conv_bias(ks[9], Cout, Cin * 1),
    }

    out = optimized_block(x, params)
    out = jax.block_until_ready(out)

    ref = reference_forward(x, params)
    assert out.shape == (N, Cout, H // 2, W // 2)
    # bf16 inputs / weights / output with f32 MXU accumulation vs. f32 reference.
    np.testing.assert_allclose(np.asarray(out), np.asarray(ref),
                               rtol=5e-2, atol=5e-2)
    print("KERNEL_OK")
</pallas_src>

<mosaic_0001>
module attributes {stable_mosaic.version = 11 : i64} {
  func.func @kernel(%arg0: i32, %arg1: memref<1x4x383xbf16, #tpu.memory_space<vmem>>, %arg2: memref<16x36xbf16, #tpu.memory_space<vmem>>, %arg3: memref<8x72xbf16, #tpu.memory_space<vmem>>, %arg4: memref<8x1xf32, #tpu.memory_space<vmem>>, %arg5: memref<8x1xf32, #tpu.memory_space<vmem>>, %arg6: memref<1x345xf32, #tpu.memory_space<vmem>>, %arg7: memref<1x8x288xbf16, #tpu.memory_space<vmem>>, %arg8: memref<36x345xbf16, #tpu.memory_space<vmem>>, %arg9: memref<72x307xbf16, #tpu.memory_space<vmem>>) attributes {dimension_semantics = [#tpu.dimension_semantics<parallel>], iteration_bounds = array<i64: 2>, scalar_prefetch = 0 : i64, scratch_operands = 2 : i64, tpu.core_type = #tpu.core_type<tc>, window_params = [{transform_indices = @transform_0, window_bounds = array<i64: 1, 4, 383>}, {pipeline_mode = #tpu.pipeline_mode<synchronous>, transform_indices = @transform_1, window_bounds = array<i64: 16, 36>}, {pipeline_mode = #tpu.pipeline_mode<synchronous>, transform_indices = @transform_2, window_bounds = array<i64: 8, 72>}, {pipeline_mode = #tpu.pipeline_mode<synchronous>, transform_indices = @transform_3, window_bounds = array<i64: 8, 1>}, {pipeline_mode = #tpu.pipeline_mode<synchronous>, transform_indices = @transform_4, window_bounds = array<i64: 8, 1>}, {pipeline_mode = #tpu.pipeline_mode<synchronous>, transform_indices = @transform_5, window_bounds = array<i64: 1, 345>}, {transform_indices = @transform_6, window_bounds = array<i64: 1, 8, 288>}]} {
    %c0 = arith.constant 0 : index
    %c0_0 = arith.constant 0 : index
    %c0_1 = arith.constant 0 : index
    %0 = vector.load %arg1[%c0, %c0_0, %c0_1] : memref<1x4x383xbf16, #tpu.memory_space<vmem>>, vector<1x4x345xbf16>
    %1 = vector.shape_cast %0 : vector<1x4x345xbf16> to vector<4x345xbf16>
    %c0_2 = arith.constant 0 : index
    %c0_3 = arith.constant 0 : index
    %2 = vector.load %arg8[%c0_2, %c0_3] : memref<36x345xbf16, #tpu.memory_space<vmem>>, vector<4x345xbf16>
    tpu.vector_store %arg8[%c0_2, %c0_3], %1 {strides = array<i32>} : memref<36x345xbf16, #tpu.memory_space<vmem>>, vector<4x345xbf16>,
    %c0_4 = arith.constant 0 : index
    %c0_5 = arith.constant 0 : index
    %c1 = arith.constant 1 : index
    %3 = vector.load %arg1[%c0_4, %c0_5, %c1] : memref<1x4x383xbf16, #tpu.memory_space<vmem>>, vector<1x4x345xbf16>
    %4 = vector.shape_cast %3 : vector<1x4x345xbf16> to vector<4x345xbf16>
    %c4 = arith.constant 4 : index
    %c0_6 = arith.constant 0 : index
    %5 = vector.load %arg8[%c4, %c0_6] : memref<36x345xbf16, #tpu.memory_space<vmem>>, vector<4x345xbf16>
    tpu.vector_store %arg8[%c4, %c0_6], %4 {strides = array<i32>} : memref<36x345xbf16, #tpu.memory_space<vmem>>, vector<4x345xbf16>,
    %c0_7 = arith.constant 0 : index
    %c0_8 = arith.constant 0 : index
    %c2 = arith.constant 2 : index
    %6 = vector.load %arg1[%c0_7, %c0_8, %c2] : memref<1x4x383xbf16, #tpu.memory_space<vmem>>, vector<1x4x345xbf16>
    %7 = vector.shape_cast %6 : vector<1x4x345xbf16> to vector<4x345xbf16>
    %c8 = arith.constant 8 : index
    %c0_9 = arith.constant 0 : index
    %8 = vector.load %arg8[%c8, %c0_9] : memref<36x345xbf16, #tpu.memory_space<vmem>>, vector<4x345xbf16>
    tpu.vector_store %arg8[%c8, %c0_9], %7 {strides = array<i32>} : memref<36x345xbf16, #tpu.memory_space<vmem>>, vector<4x345xbf16>,
    %c0_10 = arith.constant 0 : index
    %c0_11 = arith.constant 0 : index
    %c18 = arith.constant 18 : index
    %9 = vector.load %arg1[%c0_10, %c0_11, %c18] : memref<1x4x383xbf16, #tpu.memory_space<vmem>>, vector<1x4x345xbf16>
    %10 = vector.shape_cast %9 : vector<1x4x345xbf16> to vector<4x345xbf16>
    %c12 = arith.constant 12 : index
    %c0_12 = arith.constant 0 : index
    %11 = vector.load %arg8[%c12, %c0_12] : memref<36x345xbf16, #tpu.memory_space<vmem>>, vector<4x345xbf16>
    tpu.vector_store %arg8[%c12, %c0_12], %10 {strides = array<i32>} : memref<36x345xbf16, #tpu.memory_space<vmem>>, vector<4x345xbf16>,
    %c0_13 = arith.constant 0 : index
    %c0_14 = arith.constant 0 : index
    %c19 = arith.constant 19 : index
    %12 = vector.load %arg1[%c0_13, %c0_14, %c19] : memref<1x4x383xbf16, #tpu.memory_space<vmem>>, vector<1x4x345xbf16>
    %13 = vector.shape_cast %12 : vector<1x4x345xbf16> to vector<4x345xbf16>
    %c16 = arith.constant 16 : index
    %c0_15 = arith.constant 0 : index
    %14 = vector.load %arg8[%c16, %c0_15] : memref<36x345xbf16, #tpu.memory_space<vmem>>, vector<4x345xbf16>
    tpu.vector_store %arg8[%c16, %c0_15], %13 {strides = array<i32>} : memref<36x345xbf16, #tpu.memory_space<vmem>>, vector<4x345xbf16>,
    %c0_16 = arith.constant 0 : index
    %c0_17 = arith.constant 0 : index
    %c20 = arith.constant 20 : index
    %15 = vector.load %arg1[%c0_16, %c0_17, %c20] : memref<1x4x383xbf16, #tpu.memory_space<vmem>>, vector<1x4x345xbf16>
    %16 = vector.shape_cast %15 : vector<1x4x345xbf16> to vector<4x345xbf16>
    %c20_18 = arith.constant 20 : index
    %c0_19 = arith.constant 0 : index
    %17 = vector.load %arg8[%c20_18, %c0_19] : memref<36x345xbf16, #tpu.memory_space<vmem>>, vector<4x345xbf16>
    tpu.vector_store %arg8[%c20_18, %c0_19], %16 {strides = array<i32>} : memref<36x345xbf16, #tpu.memory_space<vmem>>, vector<4x345xbf16>,
    %c0_20 = arith.constant 0 : index
    %c0_21 = arith.constant 0 : index
    %c36 = arith.constant 36 : index
    %18 = vector.load %arg1[%c0_20, %c0_21, %c36] : memref<1x4x383xbf16, #tpu.memory_space<vmem>>, vector<1x4x345xbf16>
    %19 = vector.shape_cast %18 : vector<1x4x345xbf16> to vector<4x345xbf16>
    %c24 = arith.constant 24 : index
    %c0_22 = arith.constant 0 : index
    %20 = vector.load %arg8[%c24, %c0_22] : memref<36x345xbf16, #tpu.memory_space<vmem>>, vector<4x345xbf16>
    tpu.vector_store %arg8[%c24, %c0_22], %19 {strides = array<i32>} : memref<36x345xbf16, #tpu.memory_space<vmem>>, vector<4x345xbf16>,
    %c0_23 = arith.constant 0 : index
    %c0_24 = arith.constant 0 : index
    %c37 = arith.constant 37 : index
    %21 = vector.load %arg1[%c0_23, %c0_24, %c37] : memref<1x4x383xbf16, #tpu.memory_space<vmem>>, vector<1x4x345xbf16>
    %22 = vector.shape_cast %21 : vector<1x4x345xbf16> to vector<4x345xbf16>
    %c28 = arith.constant 28 : index
    %c0_25 = arith.constant 0 : index
    %23 = vector.load %arg8[%c28, %c0_25] : memref<36x345xbf16, #tpu.memory_space<vmem>>, vector<4x345xbf16>
    tpu.vector_store %arg8[%c28, %c0_25], %22 {strides = array<i32>} : memref<36x345xbf16, #tpu.memory_space<vmem>>, vector<4x345xbf16>,
    %c0_26 = arith.constant 0 : index
    %c0_27 = arith.constant 0 : index
    %c38 = arith.constant 38 : index
    %24 = vector.load %arg1[%c0_26, %c0_27, %c38] : memref<1x4x383xbf16, #tpu.memory_space<vmem>>, vector<1x4x345xbf16>
    %25 = vector.shape_cast %24 : vector<1x4x345xbf16> to vector<4x345xbf16>
    %c32 = arith.constant 32 : index
    %c0_28 = arith.constant 0 : index
    %26 = vector.load %arg8[%c32, %c0_28] : memref<36x345xbf16, #tpu.memory_space<vmem>>, vector<4x345xbf16>
    tpu.vector_store %arg8[%c32, %c0_28], %25 {strides = array<i32>} : memref<36x345xbf16, #tpu.memory_space<vmem>>, vector<4x345xbf16>,
    %c0_29 = arith.constant 0 : index
    %c0_30 = arith.constant 0 : index
    %27 = vector.load %arg2[%c0_29, %c0_30] : memref<16x36xbf16, #tpu.memory_space<vmem>>, vector<16x36xbf16>
    %c0_31 = arith.constant 0 : index
    %c0_32 = arith.constant 0 : index
    %28 = vector.load %arg8[%c0_31, %c0_32] : memref<36x345xbf16, #tpu.memory_space<vmem>>, vector<36x345xbf16>
    %cst = arith.constant dense<0.000000e+00> : vector<16x345xf32>
    %29 = tpu.matmul %27, %28, %cst {dimension_numbers = #tpu.dot_dimension_numbers<[1], [0], [0], [1], [0, 0, 1, 1], [], []>} : vector<16x36xbf16>, vector<36x345xbf16>, vector<16x345xf32> -> vector<16x345xf32>
    %30 = vector.extract_strided_slice %29 {offsets = [0, 0], sizes = [8, 345], strides = [1, 1]} : vector<16x345xf32> to vector<8x345xf32>
    %c0_33 = arith.constant 0 : index
    %c0_34 = arith.constant 0 : index
    %31 = vector.load %arg4[%c0_33, %c0_34] : memref<8x1xf32, #tpu.memory_space<vmem>>, vector<8x1xf32>
    %32 = vector.broadcast %31 : vector<8x1xf32> to vector<8x345xf32>
    %33 = arith.addf %30, %32 : vector<8x345xf32>
    %cst_35 = arith.constant 0.000000e+00 : f32
    %34 = vector.broadcast %cst_35 : f32 to vector<8x345xf32>
    %35 = arith.maximumf %33, %34 : vector<8x345xf32>
    %c0_36 = arith.constant 0 : index
    %c0_37 = arith.constant 0 : index
    %36 = vector.load %arg6[%c0_36, %c0_37] : memref<1x345xf32, #tpu.memory_space<vmem>>, vector<1x345xf32>
    %37 = vector.broadcast %36 : vector<1x345xf32> to vector<8x345xf32>
    %38 = arith.mulf %35, %37 : vector<8x345xf32>
    %39 = arith.truncf %38 : vector<8x345xf32> to vector<8x345xbf16>
    %40 = vector.extract_strided_slice %29 {offsets = [8, 19], sizes = [8, 288], strides = [1, 1]} : vector<16x345xf32> to vector<8x288xf32>
    %41 = vector.extract_strided_slice %39 {offsets = [0, 0], sizes = [8, 307], strides = [1, 1]} : vector<8x345xbf16> to vector<8x307xbf16>
    %c0_38 = arith.constant 0 : index
    %c0_39 = arith.constant 0 : index
    %42 = vector.load %arg9[%c0_38, %c0_39] : memref<72x307xbf16, #tpu.memory_space<vmem>>, vector<8x307xbf16>
    tpu.vector_store %arg9[%c0_38, %c0_39], %41 {strides = array<i32>} : memref<72x307xbf16, #tpu.memory_space<vmem>>, vector<8x307xbf16>,
    %43 = vector.extract_strided_slice %39 {offsets = [0, 1], sizes = [8, 307], strides = [1, 1]} : vector<8x345xbf16> to vector<8x307xbf16>
    %c8_40 = arith.constant 8 : index
    %c0_41 = arith.constant 0 : index
    %44 = vector.load %arg9[%c8_40, %c0_41] : memref<72x307xbf16, #tpu.memory_space<vmem>>, vector<8x307xbf16>
    tpu.vector_store %arg9[%c8_40, %c0_41], %43 {strides = array<i32>} : memref<72x307xbf16, #tpu.memory_space<vmem>>, vector<8x307xbf16>,
    %45 = vector.extract_strided_slice %39 {offsets = [0, 2], sizes = [8, 307], strides = [1, 1]} : vector<8x345xbf16> to vector<8x307xbf16>
    %c16_42 = arith.constant 16 : index
    %c0_43 = arith.constant 0 : index
    %46 = vector.load %arg9[%c16_42, %c0_43] : memref<72x307xbf16, #tpu.memory_space<vmem>>, vector<8x307xbf16>
    tpu.vector_store %arg9[%c16_42, %c0_43], %45 {strides = array<i32>} : memref<72x307xbf16, #tpu.memory_space<vmem>>, vector<8x307xbf16>,
    %47 = vector.extract_strided_slice %39 {offsets = [0, 18], sizes = [8, 307], strides = [1, 1]} : vector<8x345xbf16> to vector<8x307xbf16>
    %c24_44 = arith.constant 24 : index
    %c0_45 = arith.constant 0 : index
    %48 = vector.load %arg9[%c24_44, %c0_45] : memref<72x307xbf16, #tpu.memory_space<vmem>>, vector<8x307xbf16>
    tpu.vector_store %arg9[%c24_44, %c0_45], %47 {strides = array<i32>} : memref<72x307xbf16, #tpu.memory_space<vmem>>, vector<8x307xbf16>,
    %49 = vector.extract_strided_slice %39 {offsets = [0, 19], sizes = [8, 307], strides = [1, 1]} : vector<8x345xbf16> to vector<8x307xbf16>
    %c32_46 = arith.constant 32 : index
    %c0_47 = arith.constant 0 : index
    %50 = vector.load %arg9[%c32_46, %c0_47] : memref<72x307xbf16, #tpu.memory_space<vmem>>, vector<8x307xbf16>
    tpu.vector_store %arg9[%c32_46, %c0_47], %49 {strides = array<i32>} : memref<72x307xbf16, #tpu.memory_space<vmem>>, vector<8x307xbf16>,
    %51 = vector.extract_strided_slice %39 {offsets = [0, 20], sizes = [8, 307], strides = [1, 1]} : vector<8x345xbf16> to vector<8x307xbf16>
    %c40 = arith.constant 40 : index
    %c0_48 = arith.constant 0 : index
    %52 = vector.load %arg9[%c40, %c0_48] : memref<72x307xbf16, #tpu.memory_space<vmem>>, vector<8x307xbf16>
    tpu.vector_store %arg9[%c40, %c0_48], %51 {strides = array<i32>} : memref<72x307xbf16, #tpu.memory_space<vmem>>, vector<8x307xbf16>,
    %53 = vector.extract_strided_slice %39 {offsets = [0, 36], sizes = [8, 307], strides = [1, 1]} : vector<8x345xbf16> to vector<8x307xbf16>
    %c48 = arith.constant 48 : index
    %c0_49 = arith.constant 0 : index
    %54 = vector.load %arg9[%c48, %c0_49] : memref<72x307xbf16, #tpu.memory_space<vmem>>, vector<8x307xbf16>
    tpu.vector_store %arg9[%c48, %c0_49], %53 {strides = array<i32>} : memref<72x307xbf16, #tpu.memory_space<vmem>>, vector<8x307xbf16>,
    %55 = vector.extract_strided_slice %39 {offsets = [0, 37], sizes = [8, 307], strides = [1, 1]} : vector<8x345xbf16> to vector<8x307xbf16>
    %c56 = arith.constant 56 : index
    %c0_50 = arith.constant 0 : index
    %56 = vector.load %arg9[%c56, %c0_50] : memref<72x307xbf16, #tpu.memory_space<vmem>>, vector<8x307xbf16>
    tpu.vector_store %arg9[%c56, %c0_50], %55 {strides = array<i32>} : memref<72x307xbf16, #tpu.memory_space<vmem>>, vector<8x307xbf16>,
    %57 = vector.extract_strided_slice %39 {offsets = [0, 38], sizes = [8, 307], strides = [1, 1]} : vector<8x345xbf16> to vector<8x307xbf16>
    %c64 = arith.constant 64 : index
    %c0_51 = arith.constant 0 : index
    %58 = vector.load %arg9[%c64, %c0_51] : memref<72x307xbf16, #tpu.memory_space<vmem>>, vector<8x307xbf16>
    tpu.vector_store %arg9[%c64, %c0_51], %57 {strides = array<i32>} : memref<72x307xbf16, #tpu.memory_space<vmem>>, vector<8x307xbf16>,
    %c0_52 = arith.constant 0 : index
    %c0_53 = arith.constant 0 : index
    %59 = vector.load %arg3[%c0_52, %c0_53] : memref<8x72xbf16, #tpu.memory_space<vmem>>, vector<8x72xbf16>
    %c0_54 = arith.constant 0 : index
    %c0_55 = arith.constant 0 : index
    %60 = vector.load %arg9[%c0_54, %c0_55] : memref<72x307xbf16, #tpu.memory_space<vmem>>, vector<72x307xbf16>
    %cst_56 = arith.constant dense<0.000000e+00> : vector<8x307xf32>
    %61 = tpu.matmul %59, %60, %cst_56 {dimension_numbers = #tpu.dot_dimension_numbers<[1], [0], [0], [1], [0, 0, 1, 1], [], []>} : vector<8x72xbf16>, vector<72x307xbf16>, vector<8x307xf32> -> vector<8x307xf32>
    %62 = vector.extract_strided_slice %61 {offsets = [0, 0], sizes = [8, 288], strides = [1, 1]} : vector<8x307xf32> to vector<8x288xf32>
    %63 = vector.extract_strided_slice %61 {offsets = [0, 1], sizes = [8, 288], strides = [1, 1]} : vector<8x307xf32> to vector<8x288xf32>
    %64 = arith.addf %62, %63 : vector<8x288xf32>
    %65 = vector.extract_strided_slice %61 {offsets = [0, 18], sizes = [8, 288], strides = [1, 1]} : vector<8x307xf32> to vector<8x288xf32>
    %66 = arith.addf %64, %65 : vector<8x288xf32>
    %67 = vector.extract_strided_slice %61 {offsets = [0, 19], sizes = [8, 288], strides = [1, 1]} : vector<8x307xf32> to vector<8x288xf32>
    %68 = arith.addf %66, %67 : vector<8x288xf32>
    %69 = arith.addf %68, %40 : vector<8x288xf32>
    %c0_57 = arith.constant 0 : index
    %c0_58 = arith.constant 0 : index
    %70 = vector.load %arg5[%c0_57, %c0_58] : memref<8x1xf32, #tpu.memory_space<vmem>>, vector<8x1xf32>
    %71 = vector.broadcast %70 : vector<8x1xf32> to vector<8x288xf32>
    %72 = arith.addf %69, %71 : vector<8x288xf32>
    %73 = arith.truncf %72 : vector<8x288xf32> to vector<8x288xbf16>
    %c0_59 = arith.constant 0 : index
    %c0_60 = arith.constant 0 : index
    %c0_61 = arith.constant 0 : index
    %74 = vector.load %arg7[%c0_59, %c0_60, %c0_61] : memref<1x8x288xbf16, #tpu.memory_space<vmem>>, vector<1x8x288xbf16>
    %75 = vector.shape_cast %74 : vector<1x8x288xbf16> to vector<8x288xbf16>
    %76 = vector.shape_cast %73 : vector<8x288xbf16> to vector<1x8x288xbf16>
    tpu.vector_store %arg7[%c0_59, %c0_60, %c0_61], %76 {strides = array<i32>} : memref<1x8x288xbf16, #tpu.memory_space<vmem>>, vector<1x8x288xbf16>,
    return
  }
  func.func @transform_0(%arg0: i32) -> (i32, i32, i32) {
    %c0_i32 = arith.constant 0 : i32
    %c0_i32_0 = arith.constant 0 : i32
    %c0_i32_1 = arith.constant 0 : i32
    return %arg0, %c0_i32, %c0_i32_0 : i32, i32, i32
  }
  func.func @transform_1(%arg0: i32) -> (i32, i32) {
    %c0_i32 = arith.constant 0 : i32
    %c0_i32_0 = arith.constant 0 : i32
    %c0_i32_1 = arith.constant 0 : i32
    return %c0_i32, %c0_i32_0 : i32, i32
  }
  func.func @transform_2(%arg0: i32) -> (i32, i32) {
    %c0_i32 = arith.constant 0 : i32
    %c0_i32_0 = arith.constant 0 : i32
    %c0_i32_1 = arith.constant 0 : i32
    return %c0_i32, %c0_i32_0 : i32, i32
  }
  func.func @transform_3(%arg0: i32) -> (i32, i32) {
    %c0_i32 = arith.constant 0 : i32
    %c0_i32_0 = arith.constant 0 : i32
    %c0_i32_1 = arith.constant 0 : i32
    return %c0_i32, %c0_i32_0 : i32, i32
  }
  func.func @transform_4(%arg0: i32) -> (i32, i32) {
    %c0_i32 = arith.constant 0 : i32
    %c0_i32_0 = arith.constant 0 : i32
    %c0_i32_1 = arith.constant 0 : i32
    return %c0_i32, %c0_i32_0 : i32, i32
  }
  func.func @transform_5(%arg0: i32) -> (i32, i32) {
    %c0_i32 = arith.constant 0 : i32
    %c0_i32_0 = arith.constant 0 : i32
    %c0_i32_1 = arith.constant 0 : i32
    return %c0_i32, %c0_i32_0 : i32, i32
  }
  func.func @transform_6(%arg0: i32) -> (i32, i32, i32) {
    %c0_i32 = arith.constant 0 : i32
    %c0_i32_0 = arith.constant 0 : i32
    %c0_i32_1 = arith.constant 0 : i32
    return %arg0, %c0_i32, %c0_i32_0 : i32, i32, i32
  }
}

</mosaic_0001>

<bundles_post_ra>
// kernel: tpu_custom_call.1
= control target key start
LH: loop header
LB: loop body
LE: loop exit
PB: predicated region body
PF: predicated region fallthrough
CT: control target
= control target key end

     0   :  { %11 = vsyncpa [#allocation5], 0  ;;  %s1550_s0 = inlined_call_operand.vmem [shape: bf16[2,4,383], index: 0, kind: input, shape index: {}]   ;;  %s1551_s1 = inlined_call_operand.hbm [shape: bf16[16,36], index: 1, kind: input, shape index: {}]   ;;  %s1552_s2 = inlined_call_operand.vmem [shape: bf16[8,72], index: 2, kind: input, shape index: {}]   ;;  %s1553_s3 = inlined_call_operand.vmem [shape: f32[8,1], index: 3, kind: input, shape index: {}]   ;;  %s1554_s4 = inlined_call_operand.vmem [shape: f32[8,1], index: 4, kind: input, shape index: {}]   ;;  %s1555_s5 = inlined_call_operand.vmem [shape: f32[1,345], index: 5, kind: input, shape index: {}]   ;;  %s1556_s6 = inlined_call_operand.hbm [shape: bf16[2,8,288], index: 6, kind: output, shape index: {}]  }
   0x1   :  { %12 = vsyncpa [#allocation6], 0 }
   0x2   :  { %14 = vsyncpa [#allocation6 + $0x1], 0  ;;  %s1316_s21 = smov 0   ;;  %s1318_s22 = smov 0  }
   0x3   :  { %s1320_s23 = smov 0   ;;  %s1322_s24 = smov 0  }
   0x4 LB: > { %s1337_s25 = sadd.s32 4294967295, %s1267_s24   ;;  %s994_s26 = sadd.s32 4294967294, %s1267_s24   ;;  %s1267_s24 = sphi %s1322_s24, %s1562_s24   ;;  %s1263_s23 = sphi %s1320_s23, %s1561_s23   ;;  %s1259_s22 = sphi %s1318_s22, %s1560_s22   ;;  %s1255_s21 = sphi %s1316_s21, %s1559_s21  }
   0x5   : > { %s1341_s27 = sadd.s32 1, %s1267_s24   ;;  %s158_s28 = sadd.s32 1, %s1263_s23 }
   0x6   : > { %s155_s29 = ssub.s32 %s1267_s24, %s1341_s27  ;;  %p168_p0 = scmp.ne.s32.totalorder %s1263_s23, %s1259_s22 }
   0x7   : > { %p156_p1 = scmp.eq.s32.totalorder %s155_s29, 0  ;;  %p169_p2 = scmp.eq.s32.totalorder %s1337_s25, 1 }
   0x8   : > { %p174_p3 = scmp.ne.s32.totalorder %s1259_s22, %s1255_s21  ;;  %p175_p4 = scmp.eq.s32.totalorder %s994_s26, 1 }
   0x9   : > { %s1352_s30 = scalar_select %p156_p1, %s1263_s23, %s158_s28  }
   0xa   : > { %p1354_p5 = por %p169_p2, %p168_p0  ;;  %p1358_p6 = por %p175_p4, %p174_p3 }
   0xb   : > { %p995_p7 = scmp.ge.s32.totalorder %s1267_s24, 1  ;;  %p182_p8 = scmp.lt.s32.totalorder %s1267_s24, 3 }
   0xc   : > { %p1122_p9 = scmp.eq.s32.totalorder %s1337_s25, 0  ;;  %s193_s11 = sshll.u32 %s1551_s1, 4  ;;  %s194_s11 = int_to_ptr.hbm [resolvable:$true] %s193_s11 }
   0xd   : > { %p183_p10 = pnand %p995_p7, %p182_p8  ;;  %s1269_s12 = smov [#allocation4]  }
   0xe   : > { %s195_s13 = sshll.u32 %s1269_s12, 4  ;;  %s1270_s14 = smov 64   ;;  %s196_s13 = int_to_ptr.vmem [resolvable:$true] %s195_s13 }
   0xf   : > { %p1114_p11 = pneg %p183_p10  ;;  %s1271_s15 = smov 4  }
  0x10   : > { %231 = sbr.rel (%p183_p10) target bundleno = 845 (0x34d), region = 44 }
  0x11   : > { %p1115_p12 = pnand %p1122_p9, %p1114_p11 }
  0x13   : > { %1117 = dma.hbm_to_vmem [thread:$0]  (!%p1115_p12), %s194_s11, 128, %s196_s13, [#allocation5], %s1270_s14, %s1270_s14, %s1271_s15  }
  0x15   : > { %1246 = dma.done.wait (%p1122_p9), [#allocation5], 128  }
  0x16   : > { %1248 = vsyncadd (%p1122_p9), [#allocation5], 4294967168  ;;  %p262_p13 = scmp.lt.s32.totalorder %s1337_s25, 1  ;;  %s1272_s26 = smov 127   ;;  %vm299_vm0 = vcmask 723970   ;;  %vm276_vm1 = vcmask 721920  }
  0x17   : > { %s1273_s28 = smov 109   ;;  %s1274_s29 = smov 108   ;;  %vm294_vm2 = vcmask 1039360   ;;  %vm292_vm3 = vcmask 1043456   ;;  %vm377_vm4 = vcmask 883712   ;;  %vm356_vm5 = vcmask 891904  }
  0x18   : > { %s263_s16 = scalar_select %p262_p13, %s1337_s25, 1  ;;  %vm397_vm6 = vcmask 752640   ;;  %vm418_vm7 = vcmask 744448   ;;  %vm438_vm8 = vcmask 736256   ;;  %vm315_vm9 = vcmask 1031168  }
  0x19   : > { %s1275_s9 = smov 92   ;;  %s1276_s10 = smov 91   ;;  %vm505_vm10 = vcmask 1041408   ;;  %vm336_vm11 = vcmask 900096   ;;  %vm501_vm12 = vcmask 293888   ;;  %vm583_vm13 = vcmask 412672  }
  0x1a   : > { %s1106_s17 = smul.u32 6, %s263_s16  ;;  %s1277_s11 = smov 126   ;;  %vm774_vm14 = vcmask 588800   ;;  %vm904_vm15 = vcmask 257024  }
  0x1b   : > { %s1278_s12 = smov 90   ;;  %s1279_s13 = smov 110  }
  0x1c   : > { %s1379_s20 = scalar_lea.vmem %s1550_s0, %s1106_s17 }
  0x1d   : > { %v268_v0 = vld [vmem:[%s1379_s20] sm:$0x3f] }
  0x1e   : > { %270 = vst [vmem:[#allocation1] ss:$2 sm:$0xff] %v268_v0  ;;  %v278_v1 = vld [vmem:[%s1379_s20] sm:$0x3f] }
  0x1f   : > { %v301_v4 = vld [vmem:[%s1379_s20] sm:$0x3f] }
  0x20   : > { %v321_v7 = vld [vmem:[%s1379_s20] sm:$0x3f] }
  0x21   : > { %v342_v10 = vld [vmem:[%s1379_s20] sm:$0x3f] }
  0x22   : > { %v362_v13 = vld [vmem:[%s1379_s20] sm:$0x3f] }
  0x23   : > { %v383_v16 = vld [vmem:[%s1379_s20] sm:$0x3f] }
  0x24   : > { %v403_v19 = vld [vmem:[%s1379_s20] sm:$0x3f] }
  0x25   : > { %v271_v2 = vld.sshfl [vmem:[#allocation1] sm:$0xff pattern:$0x75643120]  ;;  %v272_v3 = vld.sshfl [vmem:[#allocation1 + $0x8] sm:$0xff pattern:$0x75643120] }
  0x26   : > { %281 = vst [vmem:[#allocation1 + $0x1] ss:$2 sm:$0xff] %v278_v1  ;;  %v424_v22 = vld [vmem:[%s1379_s20] sm:$0x3f]  ;;  %s1221_s20 = scalar_lea.hbm %s1556_s6, 24 }
  0x27   : > { %275 = vst [vmem:[#allocation2] sm:$0x33] %v271_v2 }
  0x28   : > { %277 = vst.msk [vmem:[#allocation2 + $0x8] sm:$0x3] %vm276_vm1, %v272_v3  ;;  %v1280_v3 = vmov 0  }
  0x29   : > { %1169 = vset.pattern.permute.xlu1 %v1280_v3  ;;  %1170 = vset.pattern.permute.xlu0 %v1280_v3 }
  0x2d   : > { %v282_v5 = vld.sshfl [vmem:[#allocation1] sm:$0xff pattern:$0x75643120]  ;;  %v284_v6 = vld.sshfl [vmem:[#allocation1 + $0x8] sm:$0xff pattern:$0x75643120] }
  0x2e   : > { %286 = vrot.lane.b32.xlu1 %v282_v5, %s1272_s26  ;;  %303 = vst [vmem:[#allocation1] ss:$2 sm:$0xff] %v301_v4  ;;  %288 = vrot.lane.b32.xlu2 %v284_v6, %s1272_s26 }
  0x35   : > { %v304_v8 = vld.sshfl [vmem:[#allocation1] sm:$0xff pattern:$0x75643120]  ;;  %v306_v9 = vld.sshfl [vmem:[#allocation1 + $0x8] sm:$0xff pattern:$0x75643120] }
  0x36   : > { %324 = vst [vmem:[#allocation1 + $0x1] ss:$2 sm:$0xff] %v321_v7 }
  0x3d   : > { %v325_v11 = vld.sshfl [vmem:[#allocation1] sm:$0xff pattern:$0x75643120]  ;;  %v327_v12 = vld.sshfl [vmem:[#allocation1 + $0x8] sm:$0xff pattern:$0x75643120] }
  0x3e   : > { %344 = vst [vmem:[#allocation1] ss:$2 sm:$0xff] %v342_v10 }
  0x45   : > { %v345_v14 = vld.sshfl [vmem:[#allocation1] sm:$0xff pattern:$0x75643120]  ;;  %v347_v15 = vld.sshfl [vmem:[#allocation1 + $0x8] sm:$0xff pattern:$0x75643120] }
  0x46   : > { %349 = vrot.lane.b32.xlu1 %v345_v14, %s1273_s28  ;;  %365 = vst [vmem:[#allocation1 + $0x1] ss:$2 sm:$0xff] %v362_v13 }
  0x4d   : > { %v366_v17 = vld.sshfl [vmem:[#allocation1] sm:$0xff pattern:$0x75643120]  ;;  %v368_v18 = vld.sshfl [vmem:[#allocation1 + $0x8] sm:$0xff pattern:$0x75643120] }
  0x4e   : > { %351 = vrot.lane.b32.xlu1 %v347_v15, %s1273_s28  ;;  %385 = vst [vmem:[#allocation1] ss:$2 sm:$0xff] %v383_v16  ;;  %370 = vrot.lane.b32.xlu2 %v366_v17, %s1274_s29 }
  0x55   : > { %v388_v20 = vld.sshfl [vmem:[#allocation1 + $0x8] sm:$0xff pattern:$0x75643120]  ;;  %v386_v21 = vld.sshfl [vmem:[#allocation1] sm:$0xff pattern:$0x75643120] }
  0x56   : > { %392 = vrot.lane.b32.xlu1 %v388_v20, %s1275_s9  ;;  %390 = vrot.lane.b32.xlu0 %v386_v21, %s1275_s9  ;;  %406 = vst [vmem:[#allocation1 + $0x1] ss:$2 sm:$0xff] %v403_v19  ;;  %v557_v21 = vld [vmem:[%s1553_s3] sm:$0xff] }
  0x57   : > { %372 = vrot.lane.b32.xlu2 %v368_v18, %s1274_s29 }
  0x5d   : > { %v407_v23 = vld.sshfl [vmem:[#allocation1] sm:$0xff pattern:$0x75643120]  ;;  %v409_v24 = vld.sshfl [vmem:[#allocation1 + $0x8] sm:$0xff pattern:$0x75643120] }
  0x5e   : > { %413 = vrot.lane.b32.xlu0 %v409_v24, %s1276_s10  ;;  %426 = vst [vmem:[#allocation1] ss:$2 sm:$0xff] %v424_v22  ;;  %310 = vrot.lane.b32.xlu1 %v306_v9, %s1277_s11 }
  0x5f   : > { %411 = vrot.lane.b32.xlu2 %v407_v23, %s1276_s10 }
  0x65   : > { %v427_v25 = vld.sshfl [vmem:[#allocation1] sm:$0xff pattern:$0x75643120]  ;;  %v429_v26 = vld.sshfl [vmem:[#allocation1 + $0x8] sm:$0xff pattern:$0x75643120] }
  0x66   : > { %431 = vrot.lane.b32.xlu0 %v427_v25, %s1278_s12  ;;  %560 = vperm.xlu1 %1169, %v557_v21  }
  0x67   : > { %329 = vrot.lane.b32.xlu2 %v325_v11, %s1279_s13 }
  0x6e   : > { %433 = vrot.lane.b32.xlu0 %v429_v26, %s1278_s12 }
  0x76   : > { %308 = vrot.lane.b32.xlu0 %v304_v8, %s1277_s11 }
  0x7e   : > { %331 = vrot.lane.b32.xlu0 %v327_v12, %s1279_s13 }
  0x88   : > { %v289_v27 = vpop.permute.xlu2 %288 }
  0x89   : > { %300 = vst.msk [vmem:[#allocation2 + $0x8] sm:$0xc] %vm299_vm0, %v289_v27  ;;  %v291_v28 = vrot.slane %v289_v27, 4 }
  0xa0   : > { %v287_v29 = vpop.permute.xlu1 %286 }
  0xa1   : > { %v290_v30 = vrot.slane %v287_v29, 4 }
  0xa3   : > { %v293_v31 = vsel %vm292_vm3, %v290_v30, %v291_v28 }
  0xa4   : > { %v295_v32 = vsel %vm294_vm2, %v287_v29, %v293_v31 }
  0xa5   : > { %298 = vst [vmem:[#allocation2] sm:$0xcc] %v295_v32 }
  0xa8   : > { %v371_v33 = vpop.permute.xlu2 %370 }
  0xa9   : > { %v374_v34 = vrot.slane %v371_v33, 4 }
  0xac   : > { %v1007_v28 = vld [vmem:[#allocation2] sm:$0xf]  ;;  %v1087_v31 = vld [vmem:[#allocation2 + $0x4] sm:$0xf] }
  0xb1   : > { %v373_v35 = vpop.permute.xlu2 %372 }
  0xb2   : > { %v375_v36 = vrot.slane %v373_v35, 4  ;;  %382 = vst.msk [vmem:[#allocation2 + $0x20] sm:$0xc] %vm299_vm0, %v373_v35  ;;  %v1086_v35 = vld [vmem:[#allocation4] sm:$0xff] }
  0xb4   : > { %v376_v37 = vsel %vm292_vm3, %v374_v34, %v375_v36 }
  0xb5   : > { %v378_v38 = vsel %vm377_vm4, %v371_v33, %v376_v37 }
  0xb6   : > { %381 = vst [vmem:[#allocation2 + $0x18] sm:$0xcc] %v378_v38 }
  0xb8   : > { %v350_v39 = vpop.permute.xlu1 %349 }
  0xb9   : > { %v353_v40 = vrot.slane %v350_v39, 4  ;;  %v412_v51 = vpop.permute.xlu2 %411 }
  0xba   : > { %v415_v52 = vrot.slane %v412_v51, 4 }
  0xc0   : > { %v352_v41 = vpop.permute.xlu1 %351 }
  0xc1   : > { %v354_v42 = vrot.slane %v352_v41, 4  ;;  %361 = vst.msk [vmem:[#allocation2 + $0x20] sm:$0x3] %vm276_vm1, %v352_v41  ;;  %v330_v6 = vpop.permute.xlu2 %329  ;;  %v1015_v41 = vld [vmem:[#allocation2 + $0x8] sm:$0xf] }
  0xc2   : > { %v333_v10 = vrot.slane %v330_v6, 4 }
  0xc3   : > { %v355_v43 = vsel %vm292_vm3, %v353_v40, %v354_v42 }
  0xc4   : > { %v357_v44 = vsel %vm356_vm5, %v350_v39, %v355_v43 }
  0xc5   : > { %360 = vst [vmem:[#allocation2 + $0x18] sm:$0x33] %v357_v44 }
  0xc8   : > { %v393_v45 = vpop.permute.xlu1 %392  ;;  %v391_v46 = vpop.permute.xlu0 %390  ;;  %v1027_v37 = vld [vmem:[#allocation2 + $0x20] sm:$0xf] }
  0xc9   : > { %v395_v47 = vrot.slane %v393_v45, 4  ;;  %402 = vst.msk [vmem:[#allocation2 + $0x2c] sm:$0x3] %vm276_vm1, %v393_v45  ;;  %v394_v48 = vrot.slane %v391_v46, 4 }
  0xcb   : > { %v396_v49 = vsel %vm292_vm3, %v394_v48, %v395_v47 }
  0xcc   : > { %v398_v50 = vsel %vm397_vm6, %v391_v46, %v396_v49  ;;  %v1019_v13 = vld [vmem:[#allocation2 + $0x18] sm:$0xf]  ;;  %v1090_v16 = vld [vmem:[#allocation2 + $0x1c] sm:$0xf] }
  0xcd   : > { %401 = vst [vmem:[#allocation2 + $0x24] sm:$0x33] %v398_v50  ;;  %v569_v46 = vld [vmem:[%s1555_s5] sm:$0x7] }
  0xce   : > { %v572_v47 = vperm.slane %v569_v46, 1 }
  0xd0   : > { %v414_v53 = vpop.permute.xlu0 %413  ;;  %v311_v55 = vpop.permute.xlu1 %310 }
  0xd1   : > { %v416_v54 = vrot.slane %v414_v53, 4  ;;  %423 = vst.msk [vmem:[#allocation2 + $0x2c] sm:$0xc] %vm299_vm0, %v414_v53  ;;  %v313_v0 = vrot.slane %v311_v55, 4 }
  0xd2   : > { %320 = vst.msk [vmem:[#allocation2 + $0x14] sm:$0x3] %vm276_vm1, %v311_v55 }
  0xd3   : > { %v417_v56 = vsel %vm292_vm3, %v415_v52, %v416_v54 }
  0xd4   : > { %v419_v57 = vsel %vm418_vm7, %v412_v51, %v417_v56  ;;  %v571_v51 = vperm.slane %v569_v46, 0 }
  0xd5   : > { %422 = vst [vmem:[#allocation2 + $0x24] sm:$0xcc] %v419_v57 }
  0xd8   : > { %v432_v58 = vpop.permute.xlu0 %431  ;;  %v1092_v38 = vld [vmem:[#allocation2 + $0x28] sm:$0xf0]  ;;  %v561_v43 = vpop.permute.xlu1 %560 }
  0xd9   : > { %v435_v60 = vrot.slane %v432_v58, 4  ;;  %v1028_v39 = vor.u32 %v1092_v38, %v1027_v37 }
  0xdc   : > { %v1091_v15 = vld [vmem:[#allocation2 + $0x20] sm:$0xf0]  ;;  %v1021_v17 = vld [vmem:[#allocation2 + $0x24] sm:$0xf0] }
  0xdd   : > { %v1020_v24 = vor.u32 %v1091_v15, %v1019_v13  ;;  %v1024_v25 = vor.u32 %v1090_v16, %v1021_v17 }
  0xe0   : > { %v434_v59 = vpop.permute.xlu0 %433 }
  0xe1   : > { %v436_v61 = vrot.slane %v434_v59, 4  ;;  %443 = vst.msk [vmem:[#allocation2 + $0x38] sm:$0x3] %vm276_vm1, %v434_v59  ;;  %v573_v59 = vperm.slane %v569_v46, 2 }
  0xe3   : > { %v437_v62 = vsel %vm292_vm3, %v435_v60, %v436_v61 }
  0xe4   : > { %v439_v63 = vsel %vm438_vm8, %v432_v58, %v437_v62 }
  0xe5   : > { %442 = vst [vmem:[#allocation2 + $0x30] sm:$0x33] %v439_v63 }
  0xe8   : > { %v309_v1 = vpop.permute.xlu0 %308  ;;  %v455_v26 = vld [vmem:[#allocation2 + $0x38] sm:$0x3] }
  0xe9   : > { %v312_v2 = vrot.slane %v309_v1, 4  ;;  %v485_v27 = vunpack.c.l.b16 %v455_v26 }
  0xeb   : > { %v314_v4 = vsel %vm292_vm3, %v312_v2, %v313_v0  ;;  %v494_v29 = vpack.c.b16 %v485_v27, %v485_v27 }
  0xec   : > { %v316_v5 = vsel %vm315_vm9, %v309_v1, %v314_v4  ;;  %v454_v7 = vld [vmem:[#allocation2 + $0x30] sm:$0x33] }
  0xed   : > { %319 = vst [vmem:[#allocation2 + $0xc] sm:$0x33] %v316_v5  ;;  %v483_v8 = vunpack.c.l.b16 %v454_v7  ;;  %v484_v9 = vunpack.c.h.b16 %v454_v7  ;;  %v513_v36 = vsel %vm505_vm10, %v494_v29, 0 }
  0xef   : > { %v492_v11 = vpack.c.b16 %v483_v8, %v483_v8  ;;  %v493_v12 = vpack.c.b16 %v484_v9, %v484_v9 }
  0xf0   : > { %v332_v14 = vpop.permute.xlu0 %331 }
  0xf1   : > { %v334_v18 = vrot.slane %v332_v14, 4  ;;  %341 = vst.msk [vmem:[#allocation2 + $0x14] sm:$0xc] %vm299_vm0, %v332_v14  ;;  %v507_v19 = vsel %vm505_vm10, %v492_v11, 0  ;;  %v510_v20 = vsel %vm505_vm10, %v493_v12, 0 }
  0xf2   : > { %520 = vmatpush.bf16.msra.mxu2 %v507_v19  ;;  %534 = vmatpush.bf16.msra.mxu1 %v510_v20 }
  0xf3   : > { %v335_v22 = vsel %vm292_vm3, %v333_v10, %v334_v18 }
  0xf4   : > { %v337_v23 = vsel %vm336_vm11, %v330_v6, %v335_v22 }
  0xf5   : > { %340 = vst [vmem:[#allocation2 + $0xc] sm:$0xcc] %v337_v23 }
  0xf6   : > { %521 = vmatpush.bf16.msra.mxu2 %v1020_v24  ;;  %535 = vmatpush.bf16.msra.mxu1 %v1024_v25 }
  0xf8   : > { %v1089_v40 = vld [vmem:[#allocation2 + $0x10] sm:$0xf0] }
  0xf9   : > { %v1016_v42 = vor.u32 %v1089_v40, %v1015_v41 }
  0xfc   : > { %v1088_v30 = vld [vmem:[#allocation2 + $0x8] sm:$0xf0]  ;;  %v1009_v32 = vld [vmem:[#allocation2 + $0xc] sm:$0xf0] }
  0xfd   : > { %v1008_v33 = vor.u32 %v1088_v30, %v1007_v28  ;;  %v1012_v34 = vor.u32 %v1087_v31, %v1009_v32 }
  0xff   : > { %522 = vmatpush.bf16.msra.mxu2 %v1008_v33  ;;  %536 = vmatpush.bf16.msra.mxu1 %v1012_v34 }
 0x102   : > { %1029 = vmatmul.msk.bf16.vlgmr.msra.gmra.mxu2 %vm501_vm12, %v1086_v35  ;;  %1030 = vmatmul.msk.bf16.vlgmr.msra.gmra.mxu1 %vm501_vm12, %v1086_v35 }
 0x103   : > { %548 = vmatpush.bf16.msrb.mxu2 %v513_v36 }
 0x107   : > { %549 = vmatpush.bf16.msrb.mxu2 %v1028_v39 }
 0x10b   : > { %550 = vmatpush.bf16.msrb.mxu2 %v1016_v42 }
 0x112   : > { %1031 = vmatmul.msk.bf16.vlgmr.msrb.gmra.mxu2 %vm501_vm12, %v1086_v35 }
 0x17f   : > { %v538_v44 = vpop.f32.mrf.mxu1 }
 0x180   : > { %v564_v45 = vadd.f32 %v561_v43, %v538_v44 }
 0x182   : > { %v567_v48 = vmax.f32 %v564_v45, 0.0 }
 0x184   : > { %v578_v52 = vmul.f32 %v572_v47, %v567_v48 }
 0x185   : > { %v524_v49 = vpop.f32.mrf.mxu2 }
 0x186   : > { %v563_v50 = vadd.f32 %v561_v43, %v524_v49 }
 0x188   : > { %v566_v53 = vmax.f32 %v563_v50, 0.0 }
 0x18a   : > { %v577_v54 = vmul.f32 %v571_v51, %v566_v53 }
 0x18c   : > { %v580_v55 = vpack.c.bf16 %v578_v52, %v577_v54 }
 0x18d   : > { %v526_v56 = vpop.f32.mrf.mxu2 }
 0x18e   : > { %582 = vst [vmem:[#allocation3] sm:$0xff] %v580_v55  ;;  %659 = vrot.lane.b32.xlu0 %v580_v55, %s1276_s10  ;;  %647 = vrot.lane.b32.xlu1 %v580_v55, %s1275_s9 }
 0x18f   : > { %671 = vrot.lane.b32.xlu2 %v580_v55, %s1278_s12 }
 0x195   : > { %v552_v57 = vpop.f32.mrf.mxu2 }
 0x196   : > { %v565_v58 = vadd.f32 %v561_v43, %v552_v57  ;;  %599 = vrot.lane.b32.xlu0 %v580_v55, %s1277_s11  ;;  %635 = vrot.lane.b32.xlu1 %v580_v55, %s1274_s29 }
 0x197   : > { %623 = vrot.lane.b32.xlu2 %v580_v55, %s1273_s28 }
 0x198   : > { %v568_v60 = vmax.f32 %v565_v58, 0.0 }
 0x19a   : > { %v579_v61 = vmul.f32 %v573_v59, %v568_v60 }
 0x19c   : > { %v581_v62 = vpack.c.bf16 %v579_v61, %v579_v61 }
 0x19e   : > { %673 = vrot.lane.b32.xlu0 %v581_v62, %s1278_s12  ;;  %661 = vrot.lane.b32.xlu1 %v581_v62, %s1276_s10  ;;  %584 = vst.msk [vmem:[#allocation3 + $0x8] sm:$0xf] %vm583_vm13, %v581_v62 }
 0x19f   : > { %611 = vrot.lane.b32.xlu2 %v580_v55, %s1279_s13 }
 0x1a6   : > { %625 = vrot.lane.b32.xlu0 %v581_v62, %s1273_s28  ;;  %601 = vrot.lane.b32.xlu1 %v581_v62, %s1277_s11 }
 0x1a7   : > { %649 = vrot.lane.b32.xlu2 %v581_v62, %s1275_s9  ;;  %s1107_s9 = smul.u32 12, %s1337_s25 }
 0x1a9   : > { %s918_s12 = scalar_lea.hbm %s1556_s6, %s1107_s9 }
 0x1aa   : > { %s922_s14 = sshll.u32 %s918_s12, 4  ;;  %s923_s14 = int_to_ptr.hbm [resolvable:$true] %s922_s14 }
 0x1ab   : > { %s1215_s16 = sshra.s32 %s923_s14, 4  ;;  %s1216_s16 = int_to_ptr.hbm [resolvable:$true] %s1215_s16 }
 0x1ac   : > { %s1217_s17 = scalar_lea.hbm %s1216_s16, 12  ;;  %p1222_p3 = scmp.lt.s32.totalorder %s1216_s16, %s1556_s6 }
 0x1ad   : > { %p1218_p0 = scmp.ne.s32.totalorder %s1216_s16, %s1217_s17  ;;  %p1223_p4 = scmp.lt.s32.totalorder %s1221_s20, %s1217_s17 }
 0x1ae   : > { %613 = vrot.lane.b32.xlu0 %v581_v62, %s1279_s13  ;;  %587 = vrot.lane.b32.xlu1 %v580_v55, %s1272_s26 }
 0x1af   : > { %637 = vrot.lane.b32.xlu2 %v581_v62, %s1274_s29  ;;  %p1219_p1 = pnand %p1218_p0, %p1354_p5  ;;  %p1224_p7 = por %p1223_p4, %p1222_p3 }
 0x1b1   : > { %p1220_p2 = pneg %p1219_p1 }
 0x1b3   : > { %p1225_p8 = pnand %p1224_p7, %p1220_p2 }
 0x1b6   : > { %878 = vrot.lane.b32.xlu0 %v526_v56, %s1273_s28 }
 0x1b7   : > { %589 = vrot.lane.b32.xlu2 %v581_v62, %s1272_s26 }
 0x1e9   : > { %v672_v63 = vpop.permute.xlu2 %671 }
 0x1ea   : > { %v675_v18 = vrot.slane %v672_v63, 4 }
 0x1f1   : > { %v624_v0 = vpop.permute.xlu2 %623 }
 0x1f2   : > { %v627_v31 = vrot.slane %v624_v0, 4 }
 0x1f9   : > { %v1458_v1 = vpop.permute.xlu2 %611 }
 0x1fa   : > { %v615_v55 = vrot.slane %v1458_v1, 4 }
 0x200   : > { %v660_v2 = vpop.permute.xlu0 %659  ;;  %v648_v3 = vpop.permute.xlu1 %647 }
 0x201   : > { %v651_v4 = vrot.slane %v648_v3, 4  ;;  %v650_v5 = vpop.permute.xlu2 %649  ;;  %v663_v19 = vrot.slane %v660_v2, 4 }
 0x202   : > { %v652_v6 = vrot.slane %v650_v5, 4  ;;  %658 = vst.msk [vmem:[#allocation3 + $0x50] sm:$0xf] %vm583_vm13, %v650_v5 }
 0x204   : > { %v653_v7 = vsel %vm292_vm3, %v651_v4, %v652_v6 }
 0x205   : > { %v654_v8 = vsel %vm397_vm6, %v648_v3, %v653_v7 }
 0x206   : > { %657 = vst [vmem:[#allocation3 + $0x48] sm:$0xff] %v654_v8 }
 0x208   : > { %v600_v9 = vpop.permute.xlu0 %599  ;;  %v636_v10 = vpop.permute.xlu1 %635 }
 0x209   : > { %v639_v11 = vrot.slane %v636_v10, 4  ;;  %v638_v12 = vpop.permute.xlu2 %637  ;;  %v603_v32 = vrot.slane %v600_v9, 4  ;;  %v1078_v54 = vld [vmem:[#allocation3 + $0x50] sm:$0xf] }
 0x20a   : > { %v640_v13 = vrot.slane %v638_v12, 4  ;;  %646 = vst.msk [vmem:[#allocation3 + $0x44] sm:$0xf] %vm583_vm13, %v638_v12 }
 0x20c   : > { %v641_v14 = vsel %vm292_vm3, %v639_v11, %v640_v13 }
 0x20d   : > { %v642_v15 = vsel %vm377_vm4, %v636_v10, %v641_v14  ;;  %v1070_v47 = vld [vmem:[#allocation3 + $0x48] sm:$0xf]  ;;  %v1102_v48 = vld [vmem:[#allocation3 + $0x4c] sm:$0xf] }
 0x20e   : > { %645 = vst [vmem:[#allocation3 + $0x3c] sm:$0xff] %v642_v15 }
 0x210   : > { %v674_v16 = vpop.permute.xlu0 %673  ;;  %v662_v17 = vpop.permute.xlu1 %661 }
 0x211   : > { %v676_v20 = vrot.slane %v674_v16, 4  ;;  %682 = vst.msk [vmem:[#allocation3 + $0x68] sm:$0xf] %vm583_vm13, %v674_v16  ;;  %v664_v21 = vrot.slane %v662_v17, 4  ;;  %v590_v22 = vpop.permute.xlu2 %589 }
 0x212   : > { %670 = vst.msk [vmem:[#allocation3 + $0x5c] sm:$0xf] %vm583_vm13, %v662_v17  ;;  %v592_v56 = vrot.slane %v590_v22, 4 }
 0x213   : > { %v677_v23 = vsel %vm292_vm3, %v675_v18, %v676_v20  ;;  %v665_v24 = vsel %vm292_vm3, %v663_v19, %v664_v21  ;;  %598 = vst.msk [vmem:[#allocation3 + $0x14] sm:$0xf] %vm583_vm13, %v590_v22  ;;  %v1042_v21 = vld [vmem:[#allocation3 + $0x8] sm:$0xf] }
 0x214   : > { %v678_v25 = vsel %vm438_vm8, %v672_v63, %v677_v23  ;;  %v666_v26 = vsel %vm418_vm7, %v660_v2, %v665_v24  ;;  %v1101_v2 = vld [vmem:[#allocation3 + $0x40] sm:$0xf0] }
 0x215   : > { %v744_v27 = vunpack.c.l.b16 %v678_v25  ;;  %v745_v28 = vunpack.c.h.b16 %v678_v25  ;;  %669 = vst [vmem:[#allocation3 + $0x54] sm:$0xff] %v666_v26  ;;  %v1100_v3 = vld [vmem:[#allocation3 + $0x38] sm:$0xf0]  ;;  %v1034_v26 = vld [vmem:[#allocation3] sm:$0xf] }
 0x216   : > { %v683_v25 = vld [vmem:[%s1552_s2] sm:$0xf] }
 0x217   : > { %v759_v29 = vpack.c.b16 %v744_v27, %v744_v27  ;;  %v760_v30 = vpack.c.b16 %v745_v28, %v745_v28  ;;  %v1093_v28 = vld [vmem:[#allocation3 + $0x4] sm:$0xf] }
 0x218   : > { %v626_v33 = vpop.permute.xlu0 %625  ;;  %v602_v34 = vpop.permute.xlu1 %601  ;;  %v701_v35 = vld [vmem:[#allocation3 + $0x68] sm:$0xf] }
 0x219   : > { %v628_v36 = vrot.slane %v626_v33, 4  ;;  %634 = vst.msk [vmem:[#allocation3 + $0x38] sm:$0xf] %vm583_vm13, %v626_v33  ;;  %v604_v37 = vrot.slane %v602_v34, 4  ;;  %v746_v38 = vunpack.c.l.b16 %v701_v35  ;;  %v780_v39 = vsel %vm292_vm3, %v759_v29, 0 }
 0x21a   : > { %610 = vst.msk [vmem:[#allocation3 + $0x20] sm:$0xf] %vm583_vm13, %v602_v34  ;;  %791 = vmatpush.bf16.msra.mxu3 %v780_v39  ;;  %v783_v40 = vsel %vm292_vm3, %v760_v30, 0  ;;  %v1104_v46 = vld [vmem:[#allocation3 + $0x58] sm:$0xf0]  ;;  %v540_v30 = vpop.f32.mrf.mxu1 }
 0x21b   : > { %v629_v41 = vsel %vm292_vm3, %v627_v31, %v628_v36  ;;  %v605_v42 = vsel %vm292_vm3, %v603_v32, %v604_v37  ;;  %v761_v43 = vpack.c.b16 %v746_v38, %v746_v38  ;;  %804 = vmatpush.bf16.msra.mxu0 %v783_v40  ;;  %v1079_v59 = vor.u32 %v1104_v46, %v1078_v54  ;;  %v1095_v16 = vld [vmem:[#allocation3 + $0x10] sm:$0xf0]  ;;  %v554_v37 = vpop.f32.mrf.mxu2  ;;  %v892_v38 = vld [vmem:[%s1554_s4] sm:$0xff] }
 0x21c   : > { %v630_v44 = vsel %vm356_vm5, %v624_v0, %v629_v41  ;;  %v606_v45 = vsel %vm315_vm9, %v600_v9, %v605_v42  ;;  %v1103_v50 = vld [vmem:[#allocation3 + $0x50] sm:$0xf0]  ;;  %v1072_v51 = vld [vmem:[#allocation3 + $0x54] sm:$0xf0]  ;;  %v1060_v9 = vld [vmem:[#allocation3 + $0x3c] sm:$0xf0]  ;;  %v1043_v22 = vor.u32 %v1095_v16, %v1042_v21 }
 0x21d   : > { %633 = vst [vmem:[#allocation3 + $0x30] sm:$0xff] %v630_v44  ;;  %v786_v49 = vsel %vm292_vm3, %v761_v43, 0  ;;  %v1071_v52 = vor.u32 %v1103_v50, %v1070_v47  ;;  %v1075_v53 = vor.u32 %v1102_v48, %v1072_v51 }
 0x21e   : > { %609 = vst [vmem:[#allocation3 + $0x18] sm:$0xff] %v606_v45  ;;  %817 = vmatpush.bf16.msrb.mxu1 %v786_v49 }
 0x21f   : > { %792 = vmatpush.bf16.msra.mxu3 %v1071_v52  ;;  %805 = vmatpush.bf16.msra.mxu0 %v1075_v53 }
 0x220   : > { %v614_v57 = vpop.permute.xlu0 %613  ;;  %v588_v58 = vpop.permute.xlu1 %587  ;;  %v1066_v62 = vld [vmem:[#allocation3 + $0x38] sm:$0xf] }
 0x221   : > { %v616_v60 = vrot.slane %v614_v57, 4  ;;  %622 = vst.msk [vmem:[#allocation3 + $0x2c] sm:$0xf] %vm583_vm13, %v614_v57  ;;  %v591_v61 = vrot.slane %v588_v58, 4  ;;  %v1067_v6 = vor.u32 %v1101_v2, %v1066_v62  ;;  %v1054_v12 = vld [vmem:[#allocation3 + $0x20] sm:$0xf] }
 0x222   : > { %818 = vmatpush.bf16.msrb.mxu1 %v1079_v59 }
 0x223   : > { %v617_v63 = vsel %vm292_vm3, %v615_v55, %v616_v60  ;;  %v593_v0 = vsel %vm292_vm3, %v591_v61, %v592_v56 }
 0x224   : > { %v618_v4 = vsel %vm336_vm11, %v1458_v1, %v617_v63  ;;  %v594_v5 = vsel %vm294_vm2, %v588_v58, %v593_v0  ;;  %v1058_v7 = vld [vmem:[#allocation3 + $0x30] sm:$0xf]  ;;  %v1099_v8 = vld [vmem:[#allocation3 + $0x34] sm:$0xf] }
 0x225   : > { %621 = vst [vmem:[#allocation3 + $0x24] sm:$0xff] %v618_v4  ;;  %v1059_v10 = vor.u32 %v1100_v3, %v1058_v7  ;;  %v1063_v11 = vor.u32 %v1099_v8, %v1060_v9  ;;  %v1046_v15 = vld [vmem:[#allocation3 + $0x18] sm:$0xf]  ;;  %v1096_v17 = vld [vmem:[#allocation3 + $0x1c] sm:$0xf] }
 0x226   : > { %597 = vst [vmem:[#allocation3 + $0xc] sm:$0xff] %v594_v5  ;;  %819 = vmatpush.bf16.msrb.mxu1 %v1067_v6 }
 0x227   : > { %793 = vmatpush.bf16.msra.mxu3 %v1059_v10  ;;  %806 = vmatpush.bf16.msra.mxu0 %v1063_v11 }
 0x228   : > { %v1098_v13 = vld [vmem:[#allocation3 + $0x28] sm:$0xf0]  ;;  %v879_v40 = vpop.permute.xlu0 %878 }
 0x229   : > { %v1055_v14 = vor.u32 %v1098_v13, %v1054_v12 }
 0x22b   : > { %820 = vmatpush.bf16.msrb.mxu1 %v1055_v14 }
 0x22c   : > { %v1097_v1 = vld [vmem:[#allocation3 + $0x20] sm:$0xf0]  ;;  %v1048_v18 = vld [vmem:[#allocation3 + $0x24] sm:$0xf0] }
 0x22d   : > { %v1047_v19 = vor.u32 %v1097_v1, %v1046_v15  ;;  %v1051_v20 = vor.u32 %v1096_v17, %v1048_v18  ;;  %v1094_v23 = vld [vmem:[#allocation3 + $0x8] sm:$0xf0]  ;;  %v1036_v24 = vld [vmem:[#allocation3 + $0xc] sm:$0xf0] }
 0x22e   : > { %v1035_v27 = vor.u32 %v1094_v23, %v1034_v26  ;;  %v1039_v29 = vor.u32 %v1093_v28, %v1036_v24 }
 0x22f   : > { %794 = vmatpush.bf16.msra.mxu3 %v1047_v19  ;;  %807 = vmatpush.bf16.msra.mxu0 %v1051_v20 }
 0x230   : > { %821 = vmatpush.bf16.msrb.mxu1 %v1043_v22 }
 0x233   : > { %1082 = vmatmul.msk.bf16.vlgmr.msrb.gmra.mxu1 %vm774_vm14, %v683_v25  ;;  %795 = vmatpush.bf16.msra.mxu3 %v1035_v27 }
 0x234   : > { %808 = vmatpush.bf16.msra.mxu0 %v1039_v29 }
 0x236   : > { %1080 = vmatmul.msk.bf16.vlgmr.msra.gmra.mxu3 %vm774_vm14, %v683_v25 }
 0x237   : > { %1081 = vmatmul.msk.bf16.vlgmr.msra.gmra.mxu0 %vm774_vm14, %v683_v25 }
 0x2b0   : > { %v823_v31 = vpop.f32.mrf.mxu1 }
 0x2b1   : > { %834 = vrot.lane.b32.xlu2 %v823_v31, %s1272_s26 }
 0x2b4   : > { %v810_v32 = vpop.f32.mrf.mxu0 }
 0x2b5   : > { %832 = vrot.lane.b32.xlu1 %v810_v32, %s1272_s26 }
 0x2b8   : > { %v825_v33 = vpop.f32.mrf.mxu1 }
 0x2b9   : > { %849 = vrot.lane.b32.xlu2 %v823_v31, %s1279_s13  ;;  %v797_v34 = vpop.f32.mrf.mxu3 }
 0x2ba   : > { %830 = vrot.lane.b32.xlu0 %v797_v34, %s1272_s26 }
 0x2bc   : > { %v812_v35 = vpop.f32.mrf.mxu0 }
 0x2bd   : > { %847 = vrot.lane.b32.xlu1 %v810_v32, %s1279_s13 }
 0x2c1   : > { %864 = vrot.lane.b32.xlu2 %v823_v31, %s1273_s28  ;;  %v799_v36 = vpop.f32.mrf.mxu3 }
 0x2c2   : > { %845 = vrot.lane.b32.xlu0 %v797_v34, %s1279_s13 }
 0x2c5   : > { %862 = vrot.lane.b32.xlu1 %v810_v32, %s1273_s28 }
 0x2c9   : > { %882 = vrot.lane.b32.xlu2 %v554_v37, %s1273_s28 }
 0x2ca   : > { %860 = vrot.lane.b32.xlu0 %v797_v34, %s1273_s28 }
 0x2cd   : > { %880 = vrot.lane.b32.xlu1 %v540_v30, %s1273_s28  ;;  %s259_s28 = sand.u32 1, %s1259_s22  }
 0x2ce   : > { %s1105_s29 = smul.u32 12, %s259_s28  ;;  %s907_s15 = scalar_lea.sflag [#allocation6], %s259_s28 }
 0x2d0   : > { %s261_s25 = scalar_lea.vmem [#allocation7], %s1105_s29 }
 0x2d1   : > { %s920_s13 = sshll.u32 %s261_s25, 4  ;;  %s921_s13 = int_to_ptr.vmem [resolvable:$true] %s920_s13 }
 0x2d2   : > { %895 = vperm.xlu0 %1170, %v892_v38  }
 0x30b   : > { %v835_v39 = vpop.permute.xlu2 %834 }
 0x30c   : > { %v844_v54 = vadd.f32 %v835_v39, %v823_v31 }
 0x313   : > { %v850_v42 = vpop.permute.xlu2 %849 }
 0x314   : > { %v859_v59 = vadd.f32 %v850_v42, %v844_v54 }
 0x31b   : > { %v865_v46 = vpop.permute.xlu2 %864 }
 0x31c   : > { %v874_v3 = vadd.f32 %v865_v46, %v859_v59 }
 0x323   : > { %v883_v60 = vpop.permute.xlu2 %882 }
 0x324   : > { %v891_v5 = vadd.f32 %v883_v60, %v874_v3 }
 0x327   : > { %v833_v41 = vpop.permute.xlu1 %832 }
 0x328   : > { %v838_v49 = vsel %vm294_vm2, %v833_v41, %v835_v39 }
 0x329   : > { %v843_v55 = vadd.f32 %v838_v49, %v810_v32 }
 0x32c   : > { %v831_v43 = vpop.permute.xlu0 %830 }
 0x32d   : > { %v837_v48 = vsel %vm294_vm2, %v831_v43, %v833_v41 }
 0x32e   : > { %v842_v51 = vadd.f32 %v837_v48, %v797_v34 }
 0x32f   : > { %v848_v44 = vpop.permute.xlu1 %847 }
 0x330   : > { %v853_v52 = vsel %vm336_vm11, %v848_v44, %v850_v42 }
 0x331   : > { %v858_v61 = vadd.f32 %v853_v52, %v843_v55 }
 0x334   : > { %v846_v45 = vpop.permute.xlu0 %845 }
 0x335   : > { %v852_v50 = vsel %vm336_vm11, %v846_v45, %v848_v44 }
 0x336   : > { %v857_v56 = vadd.f32 %v852_v50, %v842_v51 }
 0x337   : > { %v863_v47 = vpop.permute.xlu1 %862 }
 0x338   : > { %v868_v58 = vsel %vm356_vm5, %v863_v47, %v865_v46 }
 0x339   : > { %v873_v4 = vadd.f32 %v868_v58, %v858_v61 }
 0x33c   : > { %v861_v53 = vpop.permute.xlu0 %860 }
 0x33d   : > { %v867_v57 = vsel %vm356_vm5, %v861_v53, %v863_v47 }
 0x33e   : > { %v872_v62 = vadd.f32 %v867_v57, %v857_v56 }
 0x33f   : > { %v881_v63 = vpop.permute.xlu1 %880 }
 0x340   : > { %v884_v0 = vsel %vm356_vm5, %v879_v40, %v881_v63  ;;  %v885_v2 = vsel %vm356_vm5, %v881_v63, %v883_v60 }
 0x341   : > { %v889_v6 = vadd.f32 %v884_v0, %v872_v62  ;;  %v890_v7 = vadd.f32 %v885_v2, %v873_v4 }
 0x344   : > { %v896_v8 = vpop.permute.xlu0 %895 }
 0x345   : > { %v898_v9 = vadd.f32 %v896_v8, %v889_v6  ;;  %v899_v10 = vadd.f32 %v896_v8, %v890_v7  ;;  %v900_v11 = vadd.f32 %v896_v8, %v891_v5 }
 0x347   : > { %v901_v12 = vpack.c.bf16 %v899_v10, %v898_v9  ;;  %v902_v13 = vpack.c.bf16 %v900_v11, %v900_v11 }
 0x349   : > { %903 = vst [vmem:[%s261_s25] sm:$0xff] %v901_v12 }
 0x34a   : > { %905 = vst.msk [vmem:[%s261_s25 + $0x8] sm:$0xf] %vm904_vm15, %v902_v13 }
 0x34b   : > { %1228 = shalt.err (!%p1225_p8)
}
 0x34c   : > { %1112 = dma.vmem_to_hbm [thread:$0]  (%p1354_p5), %s921_s13, 192, %s923_s14, %s907_s15  }
 0x34d PF: > { %p1124_p9 = scmp.ge.s32.totalorder %s1267_s24, 2  ;;  %s934_s28 = sand.u32 1, %s1255_s21  }
 0x34e   : > { %s935_s9 = scalar_lea.sflag [#allocation6], %s934_s28 }
 0x34f   : > { %p1119_p10 = pnand %p1124_p9, %p1358_p6 }
 0x351   : > { %p1120_p11 = pneg %p1119_p10 }
 0x353   : > { %1250 = dma.done.wait (%p1120_p11), %s935_s9, 192  }
 0x354   : > { %1252 = vsyncadd (%p1120_p11), %s935_s9, 4294967104  ;;  %p17_p12 = scmp.ge.s32.totalorder %s1341_s27, 4   ;;  %s1559_s21 = smov %s1259_s22 }
 0x355   : > { %s1560_s22 = smov %s1263_s23  ;;  %s1561_s23 = smov %s1352_s30 }
 0x356   : > { %s1562_s24 = smov %s1341_s27  ;;  %19 = sbr.rel (!%p17_p12) target bundleno = 4 (0x4), region = 88 }
 0x35b   :  { %941 = vsyncpa [#allocation5], 1 }
 0x35c   :  { %943 = vsyncpa [#allocation5 + $0x1], 1 }
 0x35d   :  { %944 = vsyncpa [#allocation6], 1 }
 0x35e   :  { %946 = vsyncpa [#allocation6 + $0x1], 1 }

</bundles_post_ra>
